<compile_context>
chip_gen: v6e
topology: v6e:2x2x1
jax: 0.10.0
libtpu: 0.0.40
codegen_flags: <defaults>
</compile_context>

<pallas_src>
import functools

import jax
import jax.numpy as jnp
from jax.experimental import pallas as pl
from jax.experimental.pallas import tpu as pltpu


def _round_up(x: int, m: int) -> int:
    return ((x + m - 1) // m) * m


def _vmem_capacity_bytes() -> int:
    """Per-core VMEM capacity (64 MiB on v7x, 128 MiB on v5e/v6e)."""
    try:
        return int(pltpu.get_tpu_info().vmem_capacity_bytes)
    except Exception:
        return 64 * 1024 * 1024  # conservative default (v7x per-core size)


def _pick_tile(batch: int, tb: int) -> int:
    """Lane-dense batch tile: multiple of 128, scaled with B, >=2 grid steps
    when the batch allows it (so v7x can shard the parallel axis on 2 TCs)."""
    tb = max(128, (int(tb) // 128) * 128)          # force multiple of 128
    bp128 = _round_up(max(batch, 1), 128)
    tile = min(tb, bp128)
    if tile == bp128 and bp128 >= 256:
        tile = max(128, (bp128 // 2) // 128 * 128)
    return tile


def _fused_vmem_bytes(r_u: int, r_i: int, d: int, tb: int, itemsize: int) -> int:
    """Conservative VMEM estimate for the fused-gather path (per core; tables
    are duplicated per core when the grid is split across both TCs)."""
    tables = 2 * (r_u + r_i) * d * itemsize        # resident tables (x2 buffers)
    idx = 2 * 2 * tb * 4                           # uid+iid (1,TB) i32, dbl-buf
    out = 2 * tb * 4                               # (1,TB) f32 out, dbl-buf
    onehot = (r_u + r_i) * tb * (4 + itemsize)     # iota + one-hot live values
    slabs = 2 * d * tb * 4                         # gathered (D,TB) f32 slabs
    return tables + idx + out + onehot + slabs


def _gathered_vmem_bytes(d: int, tb: int, itemsize: int) -> int:
    ins = 2 * 2 * tb * d * itemsize                # two (TB,D) inputs, dbl-buf
    out = 2 * tb * 4
    work = 2 * tb * d * 4                          # f32 intermediates
    return ins + out + work


def _shrink_tile(tb: int) -> int:
    return max(128, (tb // 2) // 128 * 128)


def mf_fused_kernel(uid_ref, iid_ref, ut_ref, it_ref, o_ref):
    """Fused embedding-gather + dot + sigmoid.

    uid_ref/iid_ref: (1, TB) int32 index blocks (lane-dense).
    ut_ref: (D, num_users) user table (transposed), VMEM-resident.
    it_ref: (D, num_items) item table (transposed), VMEM-resident.
    o_ref:  (1, TB) f32 output block.
    """
    tdt = ut_ref.dtype
    uid = uid_ref[...]                                         # (1, TB) i32
    iid = iid_ref[...]
    n_users = ut_ref.shape[1]
    n_items = it_ref.shape[1]
    tb = uid.shape[1]

    # One-hot gather on the MXU: one_hot[r, b] = (idx[b] == r), so
    # table^T (D, R) @ one_hot (R, TB) = gathered slab (D, TB) with the batch
    # on the 128-lane axis.
    rows_u = jax.lax.broadcasted_iota(jnp.int32, (n_users, tb), 0)
    rows_i = jax.lax.broadcasted_iota(jnp.int32, (n_items, tb), 0)
    oh_u = (rows_u == uid).astype(tdt)                         # (R_u, TB)
    oh_i = (rows_i == iid).astype(tdt)                         # (R_i, TB)
    u_slab = jnp.dot(ut_ref[...], oh_u, preferred_element_type=jnp.float32)
    v_slab = jnp.dot(it_ref[...], oh_i, preferred_element_type=jnp.float32)

    # f32 elementwise product (VPU) + cross-sublane reduce (XLU) -> (1, TB).
    dot = jnp.sum(u_slab * v_slab, axis=0, keepdims=True)
    o_ref[...] = jax.nn.sigmoid(dot)                           # EUP, lane-dense


def mf_gathered_kernel(u_ref, v_ref, o_ref):
    """Fallback: pre-gathered (TB, D) rows -> lane-dense (1, TB) sigmoid(dot).

    The row-sum is a tiny trans_b matmul against a ones row on the (idle) MXU:
    it lands directly in the (1, TB) lane-dense layout, so there is no XLU
    transpose and no (TB, 1) masked partial store.  Accumulation is f32.
    """
    u = u_ref[...]
    v = v_ref[...]
    prod = u * v                                               # input dtype
    ones = jnp.ones((1, prod.shape[1]), prod.dtype)            # (1, D)
    dot = jax.lax.dot_general(
        ones, prod, (((1,), (1,)), ((), ())),
        preferred_element_type=jnp.float32)                    # (1, TB) f32
    o_ref[...] = jax.nn.sigmoid(dot)


@functools.partial(jax.jit, static_argnames=("tb", "force_gathered"))
def mf_forward(user, item, user_emb_table, item_emb_table, *,
               tb: int = 4096, force_gathered: bool = False):
    """user, item: int [B]; *_emb_table: [num_rows, D] (f32 or bf16).

    Returns f32 [B] = sigmoid(sum_d U[user] * V[item])."""
    B = int(user.shape[0])
    R_u, D = user_emb_table.shape
    R_i, D_i = item_emb_table.shape
    assert D == D_i, "embedding dims must match"
    assert user_emb_table.dtype == item_emb_table.dtype
    itemsize = jnp.dtype(user_emb_table.dtype).itemsize

    cap = _vmem_capacity_bytes()
    budget = int(cap * 3 // 4)                     # 25% headroom (48 MiB on v7x)

    TB = _pick_tile(B, tb)
    use_fused = not force_gathered
    if use_fused:
        while TB > 128 and _fused_vmem_bytes(R_u, R_i, D, TB, itemsize) > budget:
            TB = _shrink_tile(TB)
        use_fused = _fused_vmem_bytes(R_u, R_i, D, TB, itemsize) <= budget
    if not use_fused:
        TB = _pick_tile(B, tb)
        while TB > 128 and _gathered_vmem_bytes(D, TB, itemsize) > budget:
            TB = _shrink_tile(TB)

    Bp = _round_up(max(B, 1), TB)
    pad = Bp - B
    grid = (Bp // TB,)

    # Pad with index 0 (always a valid row); padded lanes are sliced off below.
    uid = jnp.pad(user.astype(jnp.int32), (0, pad)).reshape(1, Bp)
    iid = jnp.pad(item.astype(jnp.int32), (0, pad)).reshape(1, Bp)

    flops = 2 * Bp * D + 4 * Bp
    transcendentals = Bp
    compiler_params = pltpu.CompilerParams(
        dimension_semantics=("parallel",),
        vmem_limit_bytes=budget)

    if use_fused:
        # Table transpose is table-sized (one-time, tiny vs. the batch
        # traffic); it gives the MXU a plain (D, R) @ (R, TB) gather matmul.
        ut = user_emb_table.T                      # (D, R_u)
        it = item_emb_table.T                      # (D, R_i)
        cost = pl.CostEstimate(
            flops=flops, transcendentals=transcendentals,
            bytes_accessed=(R_u + R_i) * D * itemsize + 2 * Bp * 4 + Bp * 4)
        out = pl.pallas_call(
            mf_fused_kernel,
            out_shape=jax.ShapeDtypeStruct((1, Bp), jnp.float32),
            grid=grid,
            in_specs=[
                pl.BlockSpec((1, TB), lambda i: (0, i)),       # user ids
                pl.BlockSpec((1, TB), lambda i: (0, i)),       # item ids
                pl.BlockSpec((D, R_u), lambda i: (0, 0)),      # user table^T (resident)
                pl.BlockSpec((D, R_i), lambda i: (0, 0)),      # item table^T (resident)
            ],
            out_specs=pl.BlockSpec((1, TB), lambda i: (0, i)),
            compiler_params=compiler_params,
            cost_estimate=cost,
        )(uid, iid, ut, it)
    else:
        # Bulk XLA gather in the wrapper; NO transpose (the kernel re-layouts
        # via the MXU ones-reduce), so no extra materialized (D, Bp) pass.
        ug = jnp.take(user_emb_table, uid[0], axis=0)          # (Bp, D)
        ig = jnp.take(item_emb_table, iid[0], axis=0)          # (Bp, D)
        cost = pl.CostEstimate(
            flops=flops, transcendentals=transcendentals,
            bytes_accessed=2 * Bp * D * itemsize + Bp * 4)
        out = pl.pallas_call(
            mf_gathered_kernel,
            out_shape=jax.ShapeDtypeStruct((1, Bp), jnp.float32),
            grid=grid,
            in_specs=[
                pl.BlockSpec((TB, D), lambda i: (i, 0)),
                pl.BlockSpec((TB, D), lambda i: (i, 0)),
            ],
            out_specs=pl.BlockSpec((1, TB), lambda i: (0, i)),
            compiler_params=compiler_params,
            cost_estimate=cost,
        )(ug, ig)

    return out[0, :B]


if __name__ == "__main__":
    # Small, deterministic synthetic setup consistent with MF.__init__.
    num_users, num_items, emb_dim = 32, 48, 32
    batch = 200                                    # >128 -> exercises grid=2 + padding

    key = jax.random.PRNGKey(0)
    k_u, k_i, k_uid, k_iid = jax.random.split(key, 4)

    # nn.Embedding default init: N(0, 1).
    user_tab = jax.random.normal(k_u, (num_users, emb_dim), jnp.float32)
    item_tab = jax.random.normal(k_i, (num_items, emb_dim), jnp.float32)
    user = jax.random.randint(k_uid, (batch,), 0, num_users, dtype=jnp.int32)
    item = jax.random.randint(k_iid, (batch,), 0, num_items, dtype=jnp.int32)

    ref32 = jax.nn.sigmoid(jnp.sum(user_tab[user] * item_tab[item], axis=1))

    # 1) Fused path, f32 tables (tolerance is loose only because the MXU's
    #    default f32 matmul precision is generation-dependent; actual error is
    #    typically ~1e-6).
    out_fused = jax.block_until_ready(mf_forward(user, item, user_tab, item_tab))
    assert out_fused.shape == (batch,), out_fused.shape
    assert jnp.allclose(out_fused, ref32, atol=2e-2, rtol=2e-2)

    # 2) Fused path, bf16 tables (recommended config: halves HBM traffic; the
    #    one-hot gather is exact in bf16 and the rest of the math is f32).
    user_tab_bf = user_tab.astype(jnp.bfloat16)
    item_tab_bf = item_tab.astype(jnp.bfloat16)
    ref_bf = jax.nn.sigmoid(jnp.sum(
        user_tab_bf[user].astype(jnp.float32)
        * item_tab_bf[item].astype(jnp.float32), axis=1))
    out_bf = jax.block_until_ready(mf_forward(user, item, user_tab_bf, item_tab_bf))
    assert out_bf.shape == (batch,), out_bf.shape
    assert jnp.allclose(out_bf, ref_bf, atol=1e-3, rtol=1e-3)

    # 3) Fallback path (bulk XLA gather, no wrapper transpose), forced so it is
    #    exercised even though these tiny tables would normally take the fused
    #    path.
    out_gath = jax.block_until_ready(
        mf_forward(user, item, user_tab, item_tab, force_gathered=True))
    assert out_gath.shape == (batch,), out_gath.shape
    assert jnp.allclose(out_gath, ref32, atol=2e-2, rtol=2e-2)

    print("KERNEL_OK")
</pallas_src>

<mosaic_0001>
module attributes {stable_mosaic.version = 11 : i64} {
  func.func @mf_fused_kernel(%arg0: i32, %arg1: memref<1x128xi32, #tpu.memory_space<vmem>>, %arg2: memref<1x128xi32, #tpu.memory_space<vmem>>, %arg3: memref<32x32xf32, #tpu.memory_space<vmem>>, %arg4: memref<32x48xf32, #tpu.memory_space<vmem>>, %arg5: memref<1x128xf32, #tpu.memory_space<vmem>>) attributes {dimension_semantics = [#tpu.dimension_semantics<parallel>], iteration_bounds = array<i64: 2>, scalar_prefetch = 0 : i64, scratch_operands = 0 : i64, tpu.core_type = #tpu.core_type<tc>, window_params = [{transform_indices = @transform_0, window_bounds = array<i64: 1, 128>}, {transform_indices = @transform_1, window_bounds = array<i64: 1, 128>}, {pipeline_mode = #tpu.pipeline_mode<synchronous>, transform_indices = @transform_2, window_bounds = array<i64: 32, 32>}, {pipeline_mode = #tpu.pipeline_mode<synchronous>, transform_indices = @transform_3, window_bounds = array<i64: 32, 48>}, {transform_indices = @transform_4, window_bounds = array<i64: 1, 128>}]} {
    %c0 = arith.constant 0 : index
    %c0_0 = arith.constant 0 : index
    %0 = vector.load %arg1[%c0, %c0_0] : memref<1x128xi32, #tpu.memory_space<vmem>>, vector<1x128xi32>
    %c0_1 = arith.constant 0 : index
    %c0_2 = arith.constant 0 : index
    %1 = vector.load %arg2[%c0_1, %c0_2] : memref<1x128xi32, #tpu.memory_space<vmem>>, vector<1x128xi32>
    %2 = tpu.iota {dimensions = array<i32: 0>} : vector<32x128xi32>
    %3 = tpu.iota {dimensions = array<i32: 0>} : vector<48x128xi32>
    %4 = vector.broadcast %0 : vector<1x128xi32> to vector<32x128xi32>
    %5 = arith.cmpi eq, %2, %4 : vector<32x128xi32>
    %6 = arith.extui %5 : vector<32x128xi1> to vector<32x128xi32>
    %7 = arith.sitofp %6 : vector<32x128xi32> to vector<32x128xf32>
    %8 = vector.broadcast %1 : vector<1x128xi32> to vector<48x128xi32>
    %9 = arith.cmpi eq, %3, %8 : vector<48x128xi32>
    %10 = arith.extui %9 : vector<48x128xi1> to vector<48x128xi32>
    %11 = arith.sitofp %10 : vector<48x128xi32> to vector<48x128xf32>
    %c0_3 = arith.constant 0 : index
    %c0_4 = arith.constant 0 : index
    %12 = vector.load %arg3[%c0_3, %c0_4] : memref<32x32xf32, #tpu.memory_space<vmem>>, vector<32x32xf32>
    %cst = arith.constant dense<0.000000e+00> : vector<32x128xf32>
    %13 = tpu.matmul %12, %7, %cst {dimension_numbers = #tpu.dot_dimension_numbers<[1], [0], [0], [1], [0, 0, 1, 1], [], []>} : vector<32x32xf32>, vector<32x128xf32>, vector<32x128xf32> -> vector<32x128xf32>
    %c0_5 = arith.constant 0 : index
    %c0_6 = arith.constant 0 : index
    %14 = vector.load %arg4[%c0_5, %c0_6] : memref<32x48xf32, #tpu.memory_space<vmem>>, vector<32x48xf32>
    %cst_7 = arith.constant dense<0.000000e+00> : vector<32x128xf32>
    %15 = tpu.matmul %14, %11, %cst_7 {dimension_numbers = #tpu.dot_dimension_numbers<[1], [0], [0], [1], [0, 0, 1, 1], [], []>} : vector<32x48xf32>, vector<48x128xf32>, vector<32x128xf32> -> vector<32x128xf32>
    %16 = arith.mulf %13, %15 : vector<32x128xf32>
    %cst_8 = arith.constant dense<0.000000e+00> : vector<128xf32>
    %17 = vector.multi_reduction <add>, %16, %cst_8 [0] : vector<32x128xf32> to vector<128xf32>
    %18 = vector.shape_cast %17 : vector<128xf32> to vector<1x128xf32>
    %19 = arith.negf %18 : vector<1x128xf32>
    %20 = math.exp %19 : vector<1x128xf32>
    %cst_9 = arith.constant 1.000000e+00 : f32
    %21 = vector.broadcast %cst_9 : f32 to vector<1x128xf32>
    %22 = arith.addf %21, %20 : vector<1x128xf32>
    %23 = arith.divf %21, %22 : vector<1x128xf32>
    %c0_10 = arith.constant 0 : index
    %c0_11 = arith.constant 0 : index
    %24 = vector.load %arg5[%c0_10, %c0_11] : memref<1x128xf32, #tpu.memory_space<vmem>>, vector<1x128xf32>
    tpu.vector_store %arg5[%c0_10, %c0_11], %23 {strides = array<i32>} : memref<1x128xf32, #tpu.memory_space<vmem>>, vector<1x128xf32>,
    return
  }
  func.func @transform_0(%arg0: i32) -> (i32, i32) {
    %c0_i32 = arith.constant 0 : i32
    %c0_i32_0 = arith.constant 0 : i32
    return %c0_i32, %arg0 : i32, i32
  }
  func.func @transform_1(%arg0: i32) -> (i32, i32) {
    %c0_i32 = arith.constant 0 : i32
    %c0_i32_0 = arith.constant 0 : i32
    return %c0_i32, %arg0 : i32, i32
  }
  func.func @transform_2(%arg0: i32) -> (i32, i32) {
    %c0_i32 = arith.constant 0 : i32
    %c0_i32_0 = arith.constant 0 : i32
    %c0_i32_1 = arith.constant 0 : i32
    return %c0_i32, %c0_i32_0 : i32, i32
  }
  func.func @transform_3(%arg0: i32) -> (i32, i32) {
    %c0_i32 = arith.constant 0 : i32
    %c0_i32_0 = arith.constant 0 : i32
    %c0_i32_1 = arith.constant 0 : i32
    return %c0_i32, %c0_i32_0 : i32, i32
  }
  func.func @transform_4(%arg0: i32) -> (i32, i32) {
    %c0_i32 = arith.constant 0 : i32
    %c0_i32_0 = arith.constant 0 : i32
    return %c0_i32, %arg0 : i32, i32
  }
}

</mosaic_0001>

<bundles_post_ra>
// kernel: mf_forward.1
= control target key start
LH: loop header
LB: loop body
LE: loop exit
PB: predicated region body
PF: predicated region fallthrough
CT: control target
= control target key end

     0   :  { %9 = vsyncpa [#allocation3], 0  ;;  %s897_s0 = inlined_call_operand.vmem [shape: s32[1,256], index: 0, kind: input, shape index: {}]   ;;  %s898_s1 = inlined_call_operand.vmem [shape: s32[1,256], index: 1, kind: input, shape index: {}]   ;;  %s899_s2 = inlined_call_operand.vmem [shape: f32[32,32], index: 2, kind: input, shape index: {}]   ;;  %s900_s3 = inlined_call_operand.vmem [shape: f32[32,48], index: 3, kind: input, shape index: {}]   ;;  %s901_s4 = inlined_call_operand.hbm [shape: f32[1,256], index: 4, kind: output, shape index: {}]  }
   0x1   :  { %11 = vsyncpa [#allocation3 + $0x1], 0  ;;  %s769_s15 = smov 0   ;;  %s771_s16 = smov 0  }
   0x2   :  { %s773_s17 = smov 0   ;;  %s775_s18 = smov 0  }
   0x3 LB: > { %s790_s19 = sadd.s32 4294967295, %s740_s18   ;;  %s548_s20 = sadd.s32 4294967294, %s740_s18   ;;  %s740_s18 = sphi %s775_s18, %s907_s18   ;;  %s736_s17 = sphi %s773_s17, %s906_s17   ;;  %s732_s16 = sphi %s771_s16, %s905_s16   ;;  %s728_s15 = sphi %s769_s15, %s904_s15  }
   0x4   : > { %s794_s21 = sadd.s32 1, %s740_s18   ;;  %s118_s22 = sadd.s32 1, %s736_s17 }
   0x5   : > { %s115_s23 = ssub.s32 %s740_s18, %s794_s21  ;;  %p128_p0 = scmp.ne.s32.totalorder %s736_s17, %s732_s16 }
   0x6   : > { %p116_p1 = scmp.eq.s32.totalorder %s115_s23, 0  ;;  %p129_p2 = scmp.eq.s32.totalorder %s790_s19, 1 }
   0x7   : > { %p134_p3 = scmp.ne.s32.totalorder %s732_s16, %s728_s15  ;;  %p135_p4 = scmp.eq.s32.totalorder %s548_s20, 1 }
   0x8   : > { %s805_s24 = scalar_select %p116_p1, %s736_s17, %s118_s22  }
   0x9   : > { %p807_p5 = por %p129_p2, %p128_p0  ;;  %p811_p6 = por %p135_p4, %p134_p3 }
   0xa   : > { %p551_p7 = scmp.ge.s32.totalorder %s740_s18, 1  ;;  %p171_p8 = scmp.lt.s32.totalorder %s740_s18, 3 }
   0xc   : > { %p172_p9 = pnand %p551_p7, %p171_p8 }
   0xd   : > { %p197_p10 = scmp.lt.s32.totalorder (!%p172_p9), %s790_s19, 1  ;;  %s195_s7 = sand.u32 (!%p172_p9), 1, %s732_s16  }
   0xe   : > { %175 = sbr.rel (%p172_p9) target bundleno = 300 (0x12c), region = 36  ;;  %s196_s9 = scalar_lea.vmem (!%p172_p9), [#allocation2], %s195_s7 }
   0xf   : > { %s487_s10 = sshll.u32 (!%p172_p9), %s196_s9, 4  ;;  %s475_s14 = scalar_lea.sflag (!%p172_p9), [#allocation3], %s195_s7  ;;  %s488_s10 = int_to_ptr.vmem [resolvable:$true] %s487_s10 }
  0x10   : > { %s680_s20 = scalar_lea.vmem (!%p172_p9), %s488_s10, 16  ;;  %s743_s22 = smov (!%p172_p9), [#allocation2]  }
  0x11   : > { %p681_p11 = scmp.ne.s32.totalorder (!%p172_p9), %s488_s10, %s680_s20  ;;  %s684_s23 = sshll.u32 (!%p172_p9), %s743_s22, 4  ;;  %s685_s23 = int_to_ptr.vmem [resolvable:$false] %s684_s23 }
  0x12   : > { %p687_p0 = scmp.lt.s32.totalorder (!%p172_p9), %s488_s10, %s685_s23 }
  0x13   : > { %v205_v0 = vlaneseq  ;;  %v250_v1 = vld [vmem:[%s899_s2] sm:$0xff]  ;;  %vm254_vm0 = vcmask 261120   ;;  %vm356_vm1 = vcmask 392192   ;;  %s198_s5 = scalar_select %p197_p10, %s790_s19, 1  ;;  %v742_v11 = vmov 1.0   ;;  %v251_v12 = vld [vmem:[%s899_s2 + $0x8] sm:$0xff] }
  0x14   : > { %v352_v2 = vld [vmem:[%s900_s3] sm:$0xff]  ;;  %612 = vmatprep.mubr.msk.f32.mxu0 %vm254_vm0, %v250_v1  ;;  %v252_v13 = vld [vmem:[%s899_s2 + $0x10] sm:$0xff]  ;;  %v353_v14 = vld [vmem:[%s900_s3 + $0x8] sm:$0xff]  ;;  %p682_p12 = pnand %p681_p11, %p807_p5 }
  0x15   : > { %v206_v3 = vshrl.u32 %v205_v0, 7  ;;  %630 = vmatprep.mubr.msk.f32.mxu1 %vm356_vm1, %v352_v2  ;;  %s202_s8 = scalar_lea.vmem %s898_s1, %s198_s5  ;;  %s199_s11 = scalar_lea.vmem %s897_s0, %s198_s5  ;;  %v253_v15 = vld [vmem:[%s899_s2 + $0x18] sm:$0xff]  ;;  %v354_v16 = vld [vmem:[%s900_s3 + $0x10] sm:$0xff] }
  0x16   : > { %v557_v8 = vld [vmem:[%s202_s8] ss:$0 sm:$0xff]  ;;  %v355_v17 = vld [vmem:[%s900_s3 + $0x18] sm:$0xff]  ;;  %s583_s8 = sshll.u32 %s790_s19, 4  ;;  %p683_p13 = pneg %p682_p12 }
  0x17   : > { %v211_v4 = vadd.s32 40, %v206_v3  ;;  %v209_v5 = vadd.s32 24, %v206_v3  ;;  %v210_v6 = vadd.s32 32, %v206_v3  ;;  %v208_v7 = vadd.s32 16, %v206_v3  ;;  %v552_v9 = vld [vmem:[%s199_s11] ss:$0 sm:$0xff]  ;;  %s862_s13 = scalar_lea.hbm %s901_s4, %s583_s8 }
  0x18   : > { %v207_v10 = vadd.s32 8, %v206_v3  ;;  %vm216_vm9 = vcmp.eq.s32.totalorder %v206_v3, %v552_v9  ;;  %vm232_vm11 = vcmp.eq.s32.totalorder %v206_v3, %v557_v8  ;;  %s686_s19 = scalar_lea.vmem %s685_s23, 32 }
  0x19   : > { %vm237_vm2 = vcmp.eq.s32.totalorder %v211_v4, %v557_v8  ;;  %vm219_vm3 = vcmp.eq.s32.totalorder %v209_v5, %v552_v9  ;;  %vm236_vm4 = vcmp.eq.s32.totalorder %v210_v6, %v557_v8  ;;  %vm218_vm5 = vcmp.eq.s32.totalorder %v208_v7, %v552_v9  ;;  %p688_p1 = scmp.lt.s32.totalorder %s686_s19, %s680_s20 }
  0x1a   : > { %618 = vmatprep.subr.msk.mxu1 %vm237_vm2, %v742_v11  ;;  %604 = vmatprep.subr.msk.mxu0 %vm219_vm3, %v742_v11  ;;  %vm235_vm6 = vcmp.eq.s32.totalorder %v209_v5, %v557_v8  ;;  %vm217_vm7 = vcmp.eq.s32.totalorder %v207_v10, %v552_v9  ;;  %vm234_vm8 = vcmp.eq.s32.totalorder %v208_v7, %v557_v8 }
  0x1b   : > { %619 = vmatpush3.msk.msra.mxu1 %vm237_vm2, %v742_v11  ;;  %605 = vmatpush3.msk.msra.mxu0 %vm219_vm3, %v742_v11  ;;  %vm233_vm10 = vcmp.eq.s32.totalorder %v207_v10, %v557_v8  ;;  %p689_p2 = por %p688_p1, %p687_p0 }
  0x1c   : > { %620 = vmatprep.subr.msk.mxu1 %vm236_vm4, %v742_v11  ;;  %606 = vmatprep.subr.msk.mxu0 %vm218_vm5, %v742_v11 }
  0x1d   : > { %621 = vmatpush3.msk.msra.mxu1 %vm236_vm4, %v742_v11  ;;  %607 = vmatpush3.msk.msra.mxu0 %vm218_vm5, %v742_v11  ;;  %p690_p3 = pnand %p689_p2, %p683_p13 }
  0x1e   : > { %622 = vmatprep.subr.msk.mxu1 %vm235_vm6, %v742_v11  ;;  %608 = vmatprep.subr.msk.mxu0 %vm217_vm7, %v742_v11 }
  0x1f   : > { %623 = vmatpush3.msk.msra.mxu1 %vm235_vm6, %v742_v11  ;;  %609 = vmatpush3.msk.msra.mxu0 %vm217_vm7, %v742_v11 }
  0x20   : > { %624 = vmatprep.subr.msk.mxu1 %vm234_vm8, %v742_v11  ;;  %610 = vmatprep.subr.msk.mxu0 %vm216_vm9, %v742_v11 }
  0x21   : > { %625 = vmatpush3.msk.msra.mxu1 %vm234_vm8, %v742_v11  ;;  %611 = vmatpush3.msk.msra.mxu0 %vm216_vm9, %v742_v11 }
  0x22   : > { %626 = vmatprep.subr.msk.mxu1 %vm233_vm10, %v742_v11  ;;  %613 = vmatmul.mubr.msk.f32.vlgmr.msra.gmra.mxu0 %vm254_vm0, %v251_v12 }
  0x23   : > { %627 = vmatpush3.msk.msra.mxu1 %vm233_vm10, %v742_v11  ;;  %615 = vmatprep.mubr.msk.f32.mxu0 %vm254_vm0, %v252_v13 }
  0x24   : > { %628 = vmatprep.subr.msk.mxu1 %vm232_vm11, %v742_v11 }
  0x25   : > { %629 = vmatpush3.msk.msra.mxu1 %vm232_vm11, %v742_v11 }
  0x26   : > { %631 = vmatmul.mubr.msk.f32.vlgmr.msra.gmra.mxu1 %vm356_vm1, %v353_v14  ;;  %616 = vmatmul.mubr.msk.f32.gmra.mxu0 %vm254_vm0, %v253_v15 }
  0x27   : > { %633 = vmatprep.mubr.msk.f32.mxu1 %vm356_vm1, %v354_v16 }
  0x2a   : > { %634 = vmatmul.mubr.msk.f32.gmra.mxu1 %vm356_vm1, %v355_v17 }
  0xe2   : > { %v614_v18 = vpop.f32.mrf.mxu0 }
  0xe4   : > { %v333_v19 = vpop.f32.mrf.mxu0 }
  0xe6   : > { %v632_v20 = vpop.f32.mrf.mxu1  ;;  %v617_v21 = vpop.f32.mrf.mxu0 }
  0xe7   : > { %v455_v25 = vmul.f32 %v632_v20, %v614_v18 }
  0xe8   : > { %v435_v22 = vpop.f32.mrf.mxu1  ;;  %v343_v26 = vpop.f32.mrf.mxu0 }
  0xe9   : > { %v454_v23 = vmul.f32 %v435_v22, %v333_v19 }
  0xea   : > { %v635_v24 = vpop.f32.mrf.mxu1 }
  0xeb   : > { %v458_v28 = vadd.f32 %v455_v25, %v454_v23  ;;  %v457_v30 = vmul.f32 %v635_v24, %v617_v21 }
  0xec   : > { %v445_v27 = vpop.f32.mrf.mxu1 }
  0xed   : > { %v456_v29 = vmul.f32 %v445_v27, %v343_v26 }
  0xef   : > { %v459_v31 = vadd.f32 %v458_v28, %v456_v29 }
  0xf1   : > { %v460_v32 = vadd.f32 %v459_v31, %v457_v30 }
  0xf3   : > { %v461_v33 = vrot.slane %v460_v32, 4 }
  0xf5   : > { %v462_v34 = vadd.f32 %v461_v33, %v460_v32 }
  0xf7   : > { %v463_v35 = vrot.slane %v462_v34, 2 }
  0xf9   : > { %v464_v36 = vadd.f32 %v463_v35, %v462_v34 }
  0xfb   : > { %v465_v37 = vrot.slane %v464_v36, 1 }
  0xfd   : > { %v466_v38 = vadd.f32 %v465_v37, %v464_v36 }
  0xff   : > { %v582_v39 = vmul.f32 -1.442695, %v466_v38 }
 0x101   : > { %676 = vpow2.f32 %v582_v39 }
 0x10e   : > { %v677_v40 = vpop.eup %676 }
 0x10f   : > { %v470_v41 = vadd.f32 1.0, %v677_v40 }
 0x111   : > { %678 = vrcp.f32 %v470_v41 }
 0x11e   : > { %v679_v42 = vpop.eup %678 }
 0x11f   : > { %473 = vst [vmem:[%s196_s9] sm:$0x1] %v679_v42 }
 0x120   : > { %693 = shalt.err (!%p690_p3)
}
 0x121   : > { %s694_s27 = scalar_lea.hbm %s862_s13, 16  ;;  %s698_s30 = scalar_lea.hbm %s901_s4, 32 }
 0x122   : > { %p695_p4 = scmp.ne.s32.totalorder %s862_s13, %s694_s27  ;;  %p699_p9 = scmp.lt.s32.totalorder %s862_s13, %s901_s4 }
 0x123   : > { %p700_p10 = scmp.lt.s32.totalorder %s698_s30, %s694_s27 }
 0x124   : > { %p696_p7 = pnand %p695_p4, %p807_p5 }
 0x125   : > { %p701_p11 = por %p700_p10, %p699_p9 }
 0x126   : > { %p697_p8 = pneg %p696_p7 }
 0x128   : > { %p702_p12 = pnand %p701_p11, %p697_p8 }
 0x12a   : > { %705 = shalt.err (!%p702_p12)
}
 0x12b   : > { %636 = dma.vmem_to_hbm [thread:$0]  (%p807_p5), %s488_s10, 16, %s862_s13, %s475_s14  }
 0x12c PF: > { %p642_p13 = scmp.ge.s32.totalorder %s740_s18, 2  ;;  %s499_s7 = sand.u32 1, %s728_s15  }
 0x12d   : > { %s500_s8 = scalar_lea.sflag [#allocation3], %s499_s7 }
 0x12e   : > { %p639_p0 = pnand %p642_p13, %p811_p6 }
 0x130   : > { %p640_p1 = pneg %p639_p0 }
 0x132   : > { %723 = dma.done.wait (%p640_p1), %s500_s8, 16  }
 0x133   : > { %725 = vsyncadd (%p640_p1), %s500_s8, 4294967280  ;;  %p14_p2 = scmp.ge.s32.totalorder %s794_s21, 4   ;;  %s904_s15 = smov %s732_s16 }
 0x134   : > { %s905_s16 = smov %s736_s17  ;;  %s906_s17 = smov %s805_s24 }
 0x135   : > { %s907_s18 = smov %s794_s21  ;;  %16 = sbr.rel (!%p14_p2) target bundleno = 3 (0x3), region = 74 }
 0x13a   :  { %504 = vsyncpa [#allocation3], 1 }
 0x13b   :  { %506 = vsyncpa [#allocation3 + $0x1], 1 }

</bundles_post_ra>
